<compile_context>
chip_gen: v7x
topology: tpu7x:2x2x1
jax: 0.10.0
libtpu: 0.0.40
codegen_flags: <defaults>
</compile_context>

<pallas_src>
import functools

import jax
import jax.numpy as jnp
from jax.experimental import pallas as pl
from jax.experimental.pallas import tpu as pltpu

EPS = 1e-5  # PyTorch InstanceNorm2d default


def _instance_norm_relu(x, inv_hw):
    # x: (C, HW) f32.  Fused-stat InstanceNorm (biased variance) + ReLU.
    # sum(x) and sum(x*x) are independent -> both lane-reductions can issue
    # back-to-back instead of reduce -> subtract -> reduce.
    s1 = jnp.sum(x, axis=1, keepdims=True)
    s2 = jnp.sum(x * x, axis=1, keepdims=True)
    mean = s1 * inv_hw
    var = jnp.maximum(s2 * inv_hw - mean * mean, 0.0)
    return jnp.maximum((x - mean) * jax.lax.rsqrt(var + EPS), 0.0)


def _im2col_3x3(x, W, HW):
    # x: (C, HW) f32.  Returns (9*C, HW) register slab: row tap*C + c holds
    # channel c shifted by (dh, dw).  Wrap-around is zeroed by the caller via
    # the precomputed mask slab (one multiply).
    taps = []
    for dh in (-1, 0, 1):
        for dw in (-1, 0, 1):
            s = dh * W + dw  # flat spatial shift; shifted[:, p] = x[:, p + s]
            taps.append(x if s == 0 else pltpu.roll(x, shift=(-s) % HW, axis=1))
    return jnp.concatenate(taps, axis=0)


def final_block_kernel(x_ref, w1_ref, w2_ref, w3_ref, m1_ref, m2_ref, o_ref,
                       *, H, W):
    # x_ref: (Bn, Cin, HW) lane-dense block (Bn batch elements per grid step).
    HW = H * W
    inv_hw = 1.0 / HW
    Bn = x_ref.shape[0]
    Cmid = w3_ref.shape[1]

    # Resident operands, loaded once per step (hoisted out of the batch loop).
    w1 = w1_ref[...]       # (Cmid, 9*Cin)
    w2 = w2_ref[...]       # (Cmid, 9*Cmid)
    w3 = w3_ref[...]       # (Cout, Cmid)
    m1 = m1_ref[...]       # (9*Cin, HW) 0/1 edge masks
    m2 = m2_ref[...]       # (9*Cmid, HW)

    for b in range(Bn):    # static, unrolled
        x = x_ref[b].astype(jnp.float32)                           # (Cin, HW)

        # --- stage 1: Conv3x3 (no bias) -> InstanceNorm -> ReLU ---
        col1 = _im2col_3x3(x, W, HW) * m1                          # (9*Cin, HW)
        h = jnp.dot(w1, col1, preferred_element_type=jnp.float32)  # (Cmid, HW)
        h = _instance_norm_relu(h, inv_hw)

        # --- stage 2: Conv3x3 (no bias) -> InstanceNorm -> ReLU ---
        col2 = _im2col_3x3(h, W, HW) * m2                          # (9*Cmid, HW)
        h = jnp.dot(w2, col2, preferred_element_type=jnp.float32)  # (Cmid, HW)
        h = _instance_norm_relu(h, inv_hw)

        # --- stage 3: Conv1x1 (no bias) as VPU broadcast-FMAs (K=Cmid=2) ---
        y = w3[:, 0:1] * h[0:1, :]                                 # (Cout, HW)
        for ci in range(1, Cmid):
            y = y + w3[:, ci:ci + 1] * h[ci:ci + 1, :]

        o_ref[b] = y.astype(o_ref.dtype)                           # lane-dense store


def _edge_mask_slab(H, W, C):
    # (9*C, HW) f32 validity mask: row tap*C + c is 1 where the 3x3 tap
    # (dh, dw) stays inside the image for the pixel at that lane, else 0.
    HW = H * W
    idx = jnp.arange(HW, dtype=jnp.int32)
    hh = idx // W
    ww = idx - hh * W
    rows = []
    for dh in (-1, 0, 1):
        for dw in (-1, 0, 1):
            m = ((hh + dh >= 0) & (hh + dh < H) &
                 (ww + dw >= 0) & (ww + dw < W))
            rows.append(jnp.broadcast_to(m[None, :], (C, HW)))
    return jnp.concatenate(rows, axis=0).astype(jnp.float32)


def final_block_pallas(x_nchw, w1_hwio, w2_hwio, w3_io):
    N, Cin, H, W = x_nchw.shape
    HW = H * W
    Cmid = w1_hwio.shape[3]
    Cout = w3_io.shape[1]

    # Lane-dense activations: NCHW flattened over (H, W) -> (N, C, HW).
    x_flat = x_nchw.reshape(N, Cin, HW)
    # Weights flattened so column index == tap*Cin + cin, matching im2col rows.
    w1_flat = jnp.transpose(w1_hwio, (3, 0, 1, 2)).reshape(Cmid, 9 * Cin)
    w2_flat = jnp.transpose(w2_hwio, (3, 0, 1, 2)).reshape(Cmid, 9 * Cmid)
    w3_t = jnp.transpose(w3_io, (1, 0))                            # (Cout, Cmid)

    # Hoisted edge masks (computed once, resident in VMEM across the grid).
    mask1 = _edge_mask_slab(H, W, Cin)                             # (9*Cin, HW)
    mask2 = _edge_mask_slab(H, W, Cmid)                            # (9*Cmid, HW)

    # Batch blocking: 2 grid steps when N is even (>=2) -- minimal serial-step
    # overhead on v5e/v6e, and both v7x TensorCores get a batch slice.
    bn = N // 2 if (N >= 2 and N % 2 == 0) else 1
    grid = (N // bn,)

    kernel = functools.partial(final_block_kernel, H=H, W=W)

    out_flat = pl.pallas_call(
        kernel,
        out_shape=jax.ShapeDtypeStruct((N, Cout, HW), x_nchw.dtype),
        grid_spec=pltpu.PrefetchScalarGridSpec(
            num_scalar_prefetch=0,
            grid=grid,
            in_specs=[
                pl.BlockSpec((bn, Cin, HW), lambda n: (n, 0, 0)),
                # Constant index maps: weights/masks DMA'd once, stay resident.
                pl.BlockSpec((Cmid, 9 * Cin), lambda n: (0, 0)),
                pl.BlockSpec((Cmid, 9 * Cmid), lambda n: (0, 0)),
                pl.BlockSpec((Cout, Cmid), lambda n: (0, 0)),
                pl.BlockSpec((9 * Cin, HW), lambda n: (0, 0)),
                pl.BlockSpec((9 * Cmid, HW), lambda n: (0, 0)),
            ],
            out_specs=pl.BlockSpec((bn, Cout, HW), lambda n: (n, 0, 0)),
        ),
        compiler_params=pltpu.CompilerParams(
            dimension_semantics=("parallel",)),
    )(x_flat, w1_flat, w2_flat, w3_t, mask1, mask2)

    return out_flat.reshape(N, Cout, H, W)


# ---------------- pure-JAX reference (for correctness check) ----------------
def _ref_conv(x_nchw, w_hwio, padding):
    return jax.lax.conv_general_dilated(
        x_nchw, w_hwio, window_strides=(1, 1), padding=padding,
        dimension_numbers=("NCHW", "HWIO", "NCHW"))


def _ref_in_relu(x_nchw):
    mean = jnp.mean(x_nchw, axis=(2, 3), keepdims=True)
    var = jnp.mean((x_nchw - mean) ** 2, axis=(2, 3), keepdims=True)
    return jnp.maximum((x_nchw - mean) * jax.lax.rsqrt(var + EPS), 0.0)


def final_block_ref(x_nchw, w1, w2, w3):
    h = _ref_in_relu(_ref_conv(x_nchw, w1, "SAME"))
    h = _ref_in_relu(_ref_conv(h, w2, "SAME"))
    return _ref_conv(h, w3[None, None], "VALID")


if __name__ == "__main__":
    # Module config: in_channels=4 -> mid_channels=2, out_channels=4
    N, Cin, H, W = 2, 4, 16, 16
    Cmid, Cout = Cin // 2, 4

    key = jax.random.PRNGKey(0)
    kx, k1, k2, k3 = jax.random.split(key, 4)

    # PyTorch-style input is NCHW; the kernel consumes NCHW directly (flattened).
    x_nchw = jax.random.normal(kx, (N, Cin, H, W), jnp.float32)

    # Deterministic synthetic weights (bias-free convs, matching module shapes),
    # stored HWIO; the wrapper handles re-layout for the kernel.
    w1 = jax.random.normal(k1, (3, 3, Cin, Cmid), jnp.float32) * 0.1
    w2 = jax.random.normal(k2, (3, 3, Cmid, Cmid), jnp.float32) * 0.1
    w3 = jax.random.normal(k3, (Cmid, Cout), jnp.float32) * 0.1

    out_nchw = final_block_pallas(x_nchw, w1, w2, w3)
    out_nchw = jax.block_until_ready(out_nchw)

    ref_nchw = final_block_ref(x_nchw, w1, w2, w3)
    assert out_nchw.shape == (N, Cout, H, W)
    assert jnp.allclose(out_nchw, ref_nchw, rtol=1e-3, atol=1e-3)

    print("KERNEL_OK")
</pallas_src>

<mosaic_0001>
module attributes {stable_mosaic.version = 11 : i64} {
  func.func @final_block_kernel(%arg0: i32, %arg1: memref<1x4x256xf32, #tpu.memory_space<vmem>>, %arg2: memref<2x36xf32, #tpu.memory_space<vmem>>, %arg3: memref<2x18xf32, #tpu.memory_space<vmem>>, %arg4: memref<4x2xf32, #tpu.memory_space<vmem>>, %arg5: memref<36x256xf32, #tpu.memory_space<vmem>>, %arg6: memref<18x256xf32, #tpu.memory_space<vmem>>, %arg7: memref<1x4x256xf32, #tpu.memory_space<vmem>>) attributes {dimension_semantics = [#tpu.dimension_semantics<parallel>], iteration_bounds = array<i64: 2>, scalar_prefetch = 0 : i64, scratch_operands = 0 : i64, tpu.core_type = #tpu.core_type<tc>, window_params = [{transform_indices = @transform_0, window_bounds = array<i64: 1, 4, 256>}, {pipeline_mode = #tpu.pipeline_mode<synchronous>, transform_indices = @transform_1, window_bounds = array<i64: 2, 36>}, {pipeline_mode = #tpu.pipeline_mode<synchronous>, transform_indices = @transform_2, window_bounds = array<i64: 2, 18>}, {pipeline_mode = #tpu.pipeline_mode<synchronous>, transform_indices = @transform_3, window_bounds = array<i64: 4, 2>}, {pipeline_mode = #tpu.pipeline_mode<synchronous>, transform_indices = @transform_4, window_bounds = array<i64: 36, 256>}, {pipeline_mode = #tpu.pipeline_mode<synchronous>, transform_indices = @transform_5, window_bounds = array<i64: 18, 256>}, {transform_indices = @transform_6, window_bounds = array<i64: 1, 4, 256>}]} {
    %c0 = arith.constant 0 : index
    %c0_0 = arith.constant 0 : index
    %0 = vector.load %arg2[%c0, %c0_0] : memref<2x36xf32, #tpu.memory_space<vmem>>, vector<2x36xf32>
    %c0_1 = arith.constant 0 : index
    %c0_2 = arith.constant 0 : index
    %1 = vector.load %arg3[%c0_1, %c0_2] : memref<2x18xf32, #tpu.memory_space<vmem>>, vector<2x18xf32>
    %c0_3 = arith.constant 0 : index
    %c0_4 = arith.constant 0 : index
    %2 = vector.load %arg4[%c0_3, %c0_4] : memref<4x2xf32, #tpu.memory_space<vmem>>, vector<4x2xf32>
    %c0_5 = arith.constant 0 : index
    %c0_6 = arith.constant 0 : index
    %3 = vector.load %arg5[%c0_5, %c0_6] : memref<36x256xf32, #tpu.memory_space<vmem>>, vector<36x256xf32>
    %c0_7 = arith.constant 0 : index
    %c0_8 = arith.constant 0 : index
    %4 = vector.load %arg6[%c0_7, %c0_8] : memref<18x256xf32, #tpu.memory_space<vmem>>, vector<18x256xf32>
    %c0_9 = arith.constant 0 : index
    %c0_10 = arith.constant 0 : index
    %c0_11 = arith.constant 0 : index
    %5 = vector.load %arg1[%c0_9, %c0_10, %c0_11] : memref<1x4x256xf32, #tpu.memory_space<vmem>>, vector<1x4x256xf32>
    %6 = vector.shape_cast %5 : vector<1x4x256xf32> to vector<4x256xf32>
    %c17_i32 = arith.constant 17 : i32
    %7 = tpu.dynamic_rotate %6 by %c17_i32 dim 1 : vector<4x256xf32>, i32 -> vector<4x256xf32>
    %c16_i32 = arith.constant 16 : i32
    %8 = tpu.dynamic_rotate %6 by %c16_i32 dim 1 : vector<4x256xf32>, i32 -> vector<4x256xf32>
    %c15_i32 = arith.constant 15 : i32
    %9 = tpu.dynamic_rotate %6 by %c15_i32 dim 1 : vector<4x256xf32>, i32 -> vector<4x256xf32>
    %c1_i32 = arith.constant 1 : i32
    %10 = tpu.dynamic_rotate %6 by %c1_i32 dim 1 : vector<4x256xf32>, i32 -> vector<4x256xf32>
    %c255_i32 = arith.constant 255 : i32
    %11 = tpu.dynamic_rotate %6 by %c255_i32 dim 1 : vector<4x256xf32>, i32 -> vector<4x256xf32>
    %c241_i32 = arith.constant 241 : i32
    %12 = tpu.dynamic_rotate %6 by %c241_i32 dim 1 : vector<4x256xf32>, i32 -> vector<4x256xf32>
    %c240_i32 = arith.constant 240 : i32
    %13 = tpu.dynamic_rotate %6 by %c240_i32 dim 1 : vector<4x256xf32>, i32 -> vector<4x256xf32>
    %c239_i32 = arith.constant 239 : i32
    %14 = tpu.dynamic_rotate %6 by %c239_i32 dim 1 : vector<4x256xf32>, i32 -> vector<4x256xf32>
    %15 = tpu.concatenate %7, %8, %9, %10, %6, %11, %12, %13, %14 in 0 : vector<4x256xf32>, vector<4x256xf32>, vector<4x256xf32>, vector<4x256xf32>, vector<4x256xf32>, vector<4x256xf32>, vector<4x256xf32>, vector<4x256xf32>, vector<4x256xf32> -> vector<36x256xf32>
    %16 = arith.mulf %15, %3 : vector<36x256xf32>
    %cst = arith.constant dense<0.000000e+00> : vector<2x256xf32>
    %17 = tpu.matmul %0, %16, %cst {dimension_numbers = #tpu.dot_dimension_numbers<[1], [0], [0], [1], [0, 0, 1, 1], [], []>} : vector<2x36xf32>, vector<36x256xf32>, vector<2x256xf32> -> vector<2x256xf32>
    %cst_12 = arith.constant dense<0.000000e+00> : vector<2xf32>
    %18 = vector.multi_reduction <add>, %17, %cst_12 [1] : vector<2x256xf32> to vector<2xf32>
    %19 = vector.shape_cast %18 : vector<2xf32> to vector<2x1xf32>
    %20 = arith.mulf %17, %17 : vector<2x256xf32>
    %cst_13 = arith.constant dense<0.000000e+00> : vector<2xf32>
    %21 = vector.multi_reduction <add>, %20, %cst_13 [1] : vector<2x256xf32> to vector<2xf32>
    %22 = vector.shape_cast %21 : vector<2xf32> to vector<2x1xf32>
    %cst_14 = arith.constant 3.906250e-03 : f32
    %23 = vector.broadcast %cst_14 : f32 to vector<2x1xf32>
    %24 = arith.mulf %19, %23 : vector<2x1xf32>
    %cst_15 = arith.constant 3.906250e-03 : f32
    %25 = vector.broadcast %cst_15 : f32 to vector<2x1xf32>
    %26 = arith.mulf %22, %25 : vector<2x1xf32>
    %27 = arith.mulf %24, %24 : vector<2x1xf32>
    %28 = arith.subf %26, %27 : vector<2x1xf32>
    %cst_16 = arith.constant 0.000000e+00 : f32
    %29 = vector.broadcast %cst_16 : f32 to vector<2x1xf32>
    %30 = arith.maximumf %28, %29 : vector<2x1xf32>
    %31 = vector.broadcast %24 : vector<2x1xf32> to vector<2x256xf32>
    %32 = arith.subf %17, %31 : vector<2x256xf32>
    %cst_17 = arith.constant 9.99999974E-6 : f32
    %33 = vector.broadcast %cst_17 : f32 to vector<2x1xf32>
    %34 = arith.addf %30, %33 : vector<2x1xf32>
    %35 = math.rsqrt %34 : vector<2x1xf32>
    %36 = vector.broadcast %35 : vector<2x1xf32> to vector<2x256xf32>
    %37 = arith.mulf %32, %36 : vector<2x256xf32>
    %cst_18 = arith.constant 0.000000e+00 : f32
    %38 = vector.broadcast %cst_18 : f32 to vector<2x256xf32>
    %39 = arith.maximumf %37, %38 : vector<2x256xf32>
    %c17_i32_19 = arith.constant 17 : i32
    %40 = tpu.dynamic_rotate %39 by %c17_i32_19 dim 1 : vector<2x256xf32>, i32 -> vector<2x256xf32>
    %c16_i32_20 = arith.constant 16 : i32
    %41 = tpu.dynamic_rotate %39 by %c16_i32_20 dim 1 : vector<2x256xf32>, i32 -> vector<2x256xf32>
    %c15_i32_21 = arith.constant 15 : i32
    %42 = tpu.dynamic_rotate %39 by %c15_i32_21 dim 1 : vector<2x256xf32>, i32 -> vector<2x256xf32>
    %c1_i32_22 = arith.constant 1 : i32
    %43 = tpu.dynamic_rotate %39 by %c1_i32_22 dim 1 : vector<2x256xf32>, i32 -> vector<2x256xf32>
    %c255_i32_23 = arith.constant 255 : i32
    %44 = tpu.dynamic_rotate %39 by %c255_i32_23 dim 1 : vector<2x256xf32>, i32 -> vector<2x256xf32>
    %c241_i32_24 = arith.constant 241 : i32
    %45 = tpu.dynamic_rotate %39 by %c241_i32_24 dim 1 : vector<2x256xf32>, i32 -> vector<2x256xf32>
    %c240_i32_25 = arith.constant 240 : i32
    %46 = tpu.dynamic_rotate %39 by %c240_i32_25 dim 1 : vector<2x256xf32>, i32 -> vector<2x256xf32>
    %c239_i32_26 = arith.constant 239 : i32
    %47 = tpu.dynamic_rotate %39 by %c239_i32_26 dim 1 : vector<2x256xf32>, i32 -> vector<2x256xf32>
    %48 = tpu.concatenate %40, %41, %42, %43, %39, %44, %45, %46, %47 in 0 : vector<2x256xf32>, vector<2x256xf32>, vector<2x256xf32>, vector<2x256xf32>, vector<2x256xf32>, vector<2x256xf32>, vector<2x256xf32>, vector<2x256xf32>, vector<2x256xf32> -> vector<18x256xf32>
    %49 = arith.mulf %48, %4 : vector<18x256xf32>
    %cst_27 = arith.constant dense<0.000000e+00> : vector<2x256xf32>
    %50 = tpu.matmul %1, %49, %cst_27 {dimension_numbers = #tpu.dot_dimension_numbers<[1], [0], [0], [1], [0, 0, 1, 1], [], []>} : vector<2x18xf32>, vector<18x256xf32>, vector<2x256xf32> -> vector<2x256xf32>
    %cst_28 = arith.constant dense<0.000000e+00> : vector<2xf32>
    %51 = vector.multi_reduction <add>, %50, %cst_28 [1] : vector<2x256xf32> to vector<2xf32>
    %52 = vector.shape_cast %51 : vector<2xf32> to vector<2x1xf32>
    %53 = arith.mulf %50, %50 : vector<2x256xf32>
    %cst_29 = arith.constant dense<0.000000e+00> : vector<2xf32>
    %54 = vector.multi_reduction <add>, %53, %cst_29 [1] : vector<2x256xf32> to vector<2xf32>
    %55 = vector.shape_cast %54 : vector<2xf32> to vector<2x1xf32>
    %cst_30 = arith.constant 3.906250e-03 : f32
    %56 = vector.broadcast %cst_30 : f32 to vector<2x1xf32>
    %57 = arith.mulf %52, %56 : vector<2x1xf32>
    %cst_31 = arith.constant 3.906250e-03 : f32
    %58 = vector.broadcast %cst_31 : f32 to vector<2x1xf32>
    %59 = arith.mulf %55, %58 : vector<2x1xf32>
    %60 = arith.mulf %57, %57 : vector<2x1xf32>
    %61 = arith.subf %59, %60 : vector<2x1xf32>
    %cst_32 = arith.constant 0.000000e+00 : f32
    %62 = vector.broadcast %cst_32 : f32 to vector<2x1xf32>
    %63 = arith.maximumf %61, %62 : vector<2x1xf32>
    %64 = vector.broadcast %57 : vector<2x1xf32> to vector<2x256xf32>
    %65 = arith.subf %50, %64 : vector<2x256xf32>
    %cst_33 = arith.constant 9.99999974E-6 : f32
    %66 = vector.broadcast %cst_33 : f32 to vector<2x1xf32>
    %67 = arith.addf %63, %66 : vector<2x1xf32>
    %68 = math.rsqrt %67 : vector<2x1xf32>
    %69 = vector.broadcast %68 : vector<2x1xf32> to vector<2x256xf32>
    %70 = arith.mulf %65, %69 : vector<2x256xf32>
    %cst_34 = arith.constant 0.000000e+00 : f32
    %71 = vector.broadcast %cst_34 : f32 to vector<2x256xf32>
    %72 = arith.maximumf %70, %71 : vector<2x256xf32>
    %73 = vector.extract_strided_slice %2 {offsets = [0, 0], sizes = [4, 1], strides = [1, 1]} : vector<4x2xf32> to vector<4x1xf32>
    %74 = vector.extract_strided_slice %72 {offsets = [0, 0], sizes = [1, 256], strides = [1, 1]} : vector<2x256xf32> to vector<1x256xf32>
    %75 = vector.broadcast %73 : vector<4x1xf32> to vector<4x256xf32>
    %76 = vector.broadcast %74 : vector<1x256xf32> to vector<4x256xf32>
    %77 = arith.mulf %75, %76 : vector<4x256xf32>
    %78 = vector.extract_strided_slice %2 {offsets = [0, 1], sizes = [4, 1], strides = [1, 1]} : vector<4x2xf32> to vector<4x1xf32>
    %79 = vector.extract_strided_slice %72 {offsets = [1, 0], sizes = [1, 256], strides = [1, 1]} : vector<2x256xf32> to vector<1x256xf32>
    %80 = vector.broadcast %78 : vector<4x1xf32> to vector<4x256xf32>
    %81 = vector.broadcast %79 : vector<1x256xf32> to vector<4x256xf32>
    %82 = arith.mulf %80, %81 : vector<4x256xf32>
    %83 = arith.addf %77, %82 : vector<4x256xf32>
    %c0_35 = arith.constant 0 : index
    %c0_36 = arith.constant 0 : index
    %c0_37 = arith.constant 0 : index
    %84 = vector.load %arg7[%c0_35, %c0_36, %c0_37] : memref<1x4x256xf32, #tpu.memory_space<vmem>>, vector<1x4x256xf32>
    %85 = vector.shape_cast %84 : vector<1x4x256xf32> to vector<4x256xf32>
    %86 = vector.shape_cast %83 : vector<4x256xf32> to vector<1x4x256xf32>
    tpu.vector_store %arg7[%c0_35, %c0_36, %c0_37], %86 {strides = array<i32>} : memref<1x4x256xf32, #tpu.memory_space<vmem>>, vector<1x4x256xf32>,
    return
  }
  func.func @transform_0(%arg0: i32) -> (i32, i32, i32) {
    %c0_i32 = arith.constant 0 : i32
    %c0_i32_0 = arith.constant 0 : i32
    %c0_i32_1 = arith.constant 0 : i32
    return %arg0, %c0_i32, %c0_i32_0 : i32, i32, i32
  }
  func.func @transform_1(%arg0: i32) -> (i32, i32) {
    %c0_i32 = arith.constant 0 : i32
    %c0_i32_0 = arith.constant 0 : i32
    %c0_i32_1 = arith.constant 0 : i32
    return %c0_i32, %c0_i32_0 : i32, i32
  }
  func.func @transform_2(%arg0: i32) -> (i32, i32) {
    %c0_i32 = arith.constant 0 : i32
    %c0_i32_0 = arith.constant 0 : i32
    %c0_i32_1 = arith.constant 0 : i32
    return %c0_i32, %c0_i32_0 : i32, i32
  }
  func.func @transform_3(%arg0: i32) -> (i32, i32) {
    %c0_i32 = arith.constant 0 : i32
    %c0_i32_0 = arith.constant 0 : i32
    %c0_i32_1 = arith.constant 0 : i32
    return %c0_i32, %c0_i32_0 : i32, i32
  }
  func.func @transform_4(%arg0: i32) -> (i32, i32) {
    %c0_i32 = arith.constant 0 : i32
    %c0_i32_0 = arith.constant 0 : i32
    %c0_i32_1 = arith.constant 0 : i32
    return %c0_i32, %c0_i32_0 : i32, i32
  }
  func.func @transform_5(%arg0: i32) -> (i32, i32) {
    %c0_i32 = arith.constant 0 : i32
    %c0_i32_0 = arith.constant 0 : i32
    %c0_i32_1 = arith.constant 0 : i32
    return %c0_i32, %c0_i32_0 : i32, i32
  }
  func.func @transform_6(%arg0: i32) -> (i32, i32, i32) {
    %c0_i32 = arith.constant 0 : i32
    %c0_i32_0 = arith.constant 0 : i32
    %c0_i32_1 = arith.constant 0 : i32
    return %arg0, %c0_i32, %c0_i32_0 : i32, i32, i32
  }
}

</mosaic_0001>

<bundles_post_ra>
// kernel: tpu_custom_call.1
= control target key start
LH: loop header
LB: loop body
LE: loop exit
PB: predicated region body
PF: predicated region fallthrough
CT: control target
= control target key end

     0   :  { %11 = vsyncpa [#allocation3], 0  ;;  %s1619_s0 = inlined_call_operand.hbm [shape: f32[2,4,256], index: 0, kind: input, shape index: {}]   ;;  %s1620_s1 = inlined_call_operand.vmem [shape: f32[2,36], index: 1, kind: input, shape index: {}]   ;;  %s1621_s2 = inlined_call_operand.vmem [shape: f32[2,18], index: 2, kind: input, shape index: {}]   ;;  %s1622_s3 = inlined_call_operand.vmem [shape: f32[4,2], index: 3, kind: input, shape index: {}]   ;;  %s1623_s4 = inlined_call_operand.hbm [shape: f32[36,256], index: 4, kind: input, shape index: {}]   ;;  %s1624_s5 = inlined_call_operand.hbm [shape: f32[18,256], index: 5, kind: input, shape index: {}]   ;;  %s1625_s6 = inlined_call_operand.hbm [shape: f32[2,4,256], index: 6, kind: output, shape index: {}]  }
   0x1   :  { %13 = vsyncpa [#allocation3 + $0x1], 0 }
   0x2   :  { %14 = vsyncpa [#allocation6], 0 }
   0x3   :  { %15 = vsyncpa [#allocation4], 0 }
   0x4   :  { %17 = vsyncpa [#allocation4 + $0x1], 0  ;;  %s1213_s21 = smov 0   ;;  %s1215_s22 = smov 0  }
   0x5   :  { %s1217_s23 = smov 0   ;;  %s1219_s24 = smov 0  }
   0x6 LB: > { %s1234_s25 = sadd.s32 4294967295, %s1159_s24   ;;  %s877_s26 = sadd.s32 4294967294, %s1159_s24   ;;  %s1159_s24 = sphi %s1219_s24, %s1645_s24   ;;  %s1155_s23 = sphi %s1217_s23, %s1644_s23   ;;  %s1151_s22 = sphi %s1215_s22, %s1643_s22   ;;  %s1147_s21 = sphi %s1213_s21, %s1642_s21  }
   0x7   : > { %p43_p0 = scmp.ne.s32.totalorder %s1151_s22, %s1147_s21  ;;  %p1626_p1 = scmp.eq.s32.totalorder %s1234_s25, 0 }
   0x8   : > { %p178_p3 = scmp.eq.s32.totalorder %s877_s26, 1  ;;  %p878_p5 = scmp.ge.s32.totalorder %s1159_s24, 1 }
   0x9   : > { %p1243_p4 = por %p1626_p1, %p43_p0  ;;  %p185_p7 = scmp.lt.s32.totalorder %s1159_s24, 3 }
   0xa   : > { %p1248_p6 = por %p178_p3, %p43_p0  ;;  %s1161_s30 = smov [#allocation5]  }
   0xb   : > { %s1629_s27 = scalar_select %p1243_p4, 1, 0 }
   0xc   : > { %s1630_s28 = scalar_select %p1248_p6, 1, 0 }
   0xd   : > { %p1253_p8 = pnand %p878_p5, %p185_p7  ;;  %s206_s7 = sshll.u32 %s1161_s30, 4  ;;  %s1257_s7 = int_to_ptr.vmem [resolvable:$true] %s206_s7 }
   0xe   : > { %s1162_s9 = smov [#allocation7]   ;;  %s1003_s13 = scalar_lea.hbm %s1623_s4, 1280 }
   0xf   : > { %p927_p9 = pneg %p1253_p8  ;;  %s219_s10 = sshll.u32 %s1162_s9, 4  ;;  %s1268_s10 = int_to_ptr.vmem [resolvable:$true] %s219_s10 }
  0x10   : > { %p1004_p12 = scmp.ne.s32.totalorder %s1623_s4, %s1003_s13  ;;  %p1010_p5 = scmp.lt.u32.totalorder %s1003_s13, %s1623_s4 }
  0x11   : > { %p1264_p11 = pnand %p927_p9, %p1626_p1 }
  0x13   : > { %p1005_p13 = pneg %p1264_p11 }
  0x15   : > { %p1006_p0 = pnand %p1005_p13, %p1004_p12 }
  0x17   : > { %p1007_p3 = pneg %p1006_p0 }
  0x19   : > { %p1012_p7 = pnand %p1010_p5, %p1007_p3 }
  0x1b   : > { %1015 = shalt.err (!%p1012_p7)
}
  0x1c   : > { %s1016_s18 = scalar_lea.vmem %s1257_s7, 1280  ;;  %p1024_p2 = scmp.lt.s32.totalorder %s1257_s7, %s1257_s7 }
  0x1d   : > { %p1017_p9 = scmp.ne.s32.totalorder %s1257_s7, %s1016_s18  ;;  %p1025_p12 = scmp.lt.s32.totalorder %s1016_s18, %s1016_s18 }
  0x1f   : > { %p1019_p10 = pnand %p1017_p9, %p1005_p13  ;;  %p1026_p0 = por %p1025_p12, %p1024_p2 }
  0x21   : > { %p1020_p1 = pneg %p1019_p10 }
  0x23   : > { %p1027_p6 = pnand %p1026_p0, %p1020_p1 }
  0x25   : > { %1030 = shalt.err (!%p1027_p6)
}
  0x26   : > { %s1163_s19 = smov 256   ;;  %s1164_s20 = smov 16  }
  0x27   : > { %930 = dma.hbm_to_vmem [thread:$0]  (!%p1264_p11), %s1623_s4, 1280, %s1257_s7, [#allocation6], %s1163_s19, %s1163_s19, %s1164_s20  }
  0x28   : > { %s1031_s12 = scalar_lea.hbm %s1624_s5, 768 }
  0x29   : > { %p1032_p2 = scmp.ne.s32.totalorder %s1624_s5, %s1031_s12  ;;  %p1038_p10 = scmp.lt.u32.totalorder %s1031_s12, %s1624_s5 }
  0x2b   : > { %p1034_p1 = pnand %p1032_p2, %p1005_p13 }
  0x2d   : > { %p1035_p6 = pneg %p1034_p1 }
  0x2f   : > { %p1040_p3 = pnand %p1038_p10, %p1035_p6 }
  0x31   : > { %1043 = shalt.err (!%p1040_p3)
}
  0x32   : > { %s1044_s7 = scalar_lea.vmem %s1268_s10, 768  ;;  %p1052_p12 = scmp.lt.s32.totalorder %s1268_s10, %s1268_s10 }
  0x33   : > { %p1045_p5 = scmp.ne.s32.totalorder %s1268_s10, %s1044_s7  ;;  %p1053_p0 = scmp.lt.s32.totalorder %s1044_s7, %s1044_s7 }
  0x35   : > { %p1047_p7 = pnand %p1045_p5, %p1005_p13  ;;  %p1054_p2 = por %p1053_p0, %p1052_p12 }
  0x37   : > { %p1048_p9 = pneg %p1047_p7 }
  0x39   : > { %p1055_p1 = pnand %p1054_p2, %p1048_p9 }
  0x3b   : > { %1058 = shalt.err (!%p1055_p1)
}
  0x3c   : > { %933 = dma.hbm_to_vmem [thread:$0]  (!%p1264_p11), %s1624_s5, 768, %s1268_s10, [#allocation6], %s1163_s19, %s1163_s19, %s1164_s20  }
  0x3d   : > { %s1323_s26 = sadd.s32 1, %s1159_s24   ;;  %s30_s8 = sadd.s32 1, %s1155_s23 }
  0x3e   : > { %s27_s30 = ssub.s32 %s1159_s24, %s1323_s26  ;;  %p37_p13 = scmp.ne.s32.totalorder %s1155_s23, %s1151_s22 }
  0x3f   : > { %p28_p6 = scmp.eq.s32.totalorder %s27_s30, 0  ;;  %p38_p10 = scmp.eq.s32.totalorder %s1159_s24, 0 }
  0x40   : > { %p1633_p3 = scmp.eq.s32.totalorder %s1234_s25, 1  ;;  %p944_p7 = scmp.lt.s32.totalorder %s1159_s24, 2 }
  0x41   : > { %s1339_s11 = scalar_select %p28_p6, %s1155_s23, %s30_s8  }
  0x42   : > { %p1333_p5 = por %p1633_p3, %p37_p13  ;;  %p39_p9 = por %p38_p10, %p37_p13 }
  0x43   : > { %s233_s12 = sand.u32 1, %s1155_s23   ;;  %s901_s10 = sshll.u32 %s1159_s24, 7 }
  0x44   : > { %s1634_s9 = scalar_select %p1333_p5, 1, 0 }
  0x45   : > { %s882_s13 = sshll.u32 %s233_s12, 3  ;;  %s1346_s14 = scalar_lea.hbm %s1619_s0, %s901_s10 }
  0x46   : > { %s237_s15 = scalar_lea.vmem [#allocation2], %s882_s13  ;;  %p1350_p11 = pnand %p944_p7, %p39_p9 }
  0x47   : > { %s245_s16 = sshll.u32 %s237_s15, 4  ;;  %s234_s17 = scalar_lea.sflag [#allocation3], %s233_s12  ;;  %s1348_s16 = int_to_ptr.vmem [resolvable:$true] %s245_s16 }
  0x48   : > { %s1059_s18 = scalar_lea.hbm %s1346_s14, 128  ;;  %p1061_p0 = pneg %p1350_p11 }
  0x49   : > { %p1060_p12 = scmp.ne.s32.totalorder %s1346_s14, %s1059_s18  ;;  %s1064_s13 = scalar_lea.hbm %s1619_s0, 256 }
  0x4a   : > { %p1065_p13 = scmp.lt.u32.totalorder %s1346_s14, %s1619_s0  ;;  %p1066_p6 = scmp.lt.u32.totalorder %s1064_s13, %s1059_s18 }
  0x4b   : > { %p1062_p2 = pnand %p1061_p0, %p1060_p12  ;;  %p1068_p3 = scmp.lt.u32.totalorder %s1059_s18, %s1346_s14 }
  0x4c   : > { %p1067_p10 = por %p1066_p6, %p1065_p13 }
  0x4d   : > { %p1063_p1 = pneg %p1062_p2 }
  0x4e   : > { %p1069_p7 = por %p1068_p3, %p1067_p10 }
  0x50   : > { %p1070_p9 = pnand %p1069_p7, %p1063_p1 }
  0x52   : > { %1073 = shalt.err (!%p1070_p9)
}
  0x53   : > { %s1074_s12 = scalar_lea.vmem %s1348_s16, 128  ;;  %s1165_s20 = smov [#allocation2]  }
  0x54   : > { %p1075_p12 = scmp.ne.s32.totalorder %s1348_s16, %s1074_s12  ;;  %s1079_s15 = sshll.u32 %s1165_s20, 4  ;;  %s1080_s15 = int_to_ptr.vmem [resolvable:$false] %s1079_s15 }
  0x55   : > { %s1081_s8 = scalar_lea.vmem %s1080_s15, 256  ;;  %p1082_p4 = scmp.lt.s32.totalorder %s1348_s16, %s1080_s15 }
  0x56   : > { %p1077_p2 = pnand %p1075_p12, %p1061_p0  ;;  %p1083_p13 = scmp.lt.s32.totalorder %s1081_s8, %s1074_s12 }
  0x58   : > { %p1078_p5 = pneg %p1077_p2  ;;  %p1084_p6 = por %p1083_p13, %p1082_p4 }
  0x5a   : > { %p1085_p10 = pnand %p1084_p6, %p1078_p5 }
  0x5c   : > { %1088 = shalt.err (!%p1085_p10)
}
  0x5d   : > { %937 = dma.hbm_to_vmem [thread:$0]  (!%p1350_p11), %s1346_s14, 128, %s1348_s16, %s234_s17  }
  0x5e   : > { %254 = sbr.rel (%p1253_p8) target bundleno = 1198 (0x4ae), region = 44  ;;  %s1382_s18 = sand.u32 (!%p1253_p8), 1, %s1151_s22  }
  0x5f   : > { %s886_s30 = sshll.u32 (!%p1253_p8), %s1382_s18, 3  ;;  %s257_s13 = scalar_lea.sflag (!%p1253_p8), [#allocation3], %s1382_s18 }
  0x60   : > { %s260_s10 = scalar_lea.vmem (!%p1253_p8), [#allocation2], %s886_s30  ;;  %p1636_p4 = scmp.ne.s32.totalorder (!%p1253_p8), %s1629_s27, 0 }
  0x65   : > { %1134 = dma.done.wait (%p1636_p4), %s257_s13, 128  }
  0x66   : > { %1136 = vsyncadd (%p1636_p4), %s257_s13, 4294967168  ;;  %p1637_p5 = scmp.eq.s32.totalorder %s1234_s25, 0 }
  0x68   : > { %1138 = dma.done.wait (%p1637_p5), [#allocation6], 2048   ;;  %p1638_p8 = pmov %p1637_p5 }
  0x69   : > { %v1396_v0 = vld [vmem:[%s260_s10] sm:$0xff]  ;;  %s1166_s29 = smov 1   ;;  %s1167_s14 = smov 16   ;;  %v1172_v2 = vmov 0.0   ;;  %v324_v3 = vlaneseq  ;;  %vm402_vm3 = vcmask 1043456   ;;  %v301_v19 = vld [vmem:[#allocation5 + $0x8] sm:$0xff] }
  0x6a   : > { %1140 = vsyncadd (%p1638_p8), [#allocation6], 4294965248  ;;  %343 = vrot.lane.b32.xlu1 %v1396_v0, %s1166_s29  ;;  %329 = vrot.lane.b32.xlu0 %v1396_v0, %s1167_s14  ;;  %v1404_v1 = vcombine.high %v1396_v0, %v1396_v0  ;;  %s1168_s27 = smov 17   ;;  %s1169_s16 = smov 15   ;;  %v303_v24 = vld [vmem:[#allocation5 + $0x18] sm:$0xff]  ;;  %v300_v26 = vld [vmem:[#allocation5] sm:$0xff] }
  0x6b   : > { %s1170_s7 = smov 127   ;;  %s1171_s17 = smov 112   ;;  %495 = vmatprep.mubr.f32.mxu0 %v1172_v2  ;;  %705 = vmatprep.mubr.f32.mxu1 %v1172_v2  ;;  %v1435_v6 = vand.u32 127, %v324_v3  ;;  %v302_v27 = vld [vmem:[#allocation5 + $0x10] sm:$0xff]  ;;  %v305_v49 = vld [vmem:[#allocation5 + $0x28] sm:$0xff]  ;;  %v307_v57 = vld [vmem:[#allocation5 + $0x38] sm:$0xff] }
  0x6c   : > { %s1173_s19 = smov 113   ;;  %s1174_s12 = smov 111   ;;  %v306_v56 = vld [vmem:[#allocation5 + $0x30] sm:$0xff]  ;;  %v304_v58 = vld [vmem:[#allocation5 + $0x20] sm:$0xff]  ;;  %vm421_vm9 = vcmask 293888   ;;  %vm502_vm10 = vcmask 1041408  }
  0x6d   : > { %vm347_vm0 = vcmp.lt.s32.totalorder %v1435_v6, 1  ;;  %vm333_vm1 = vcmp.lt.s32.totalorder %v1435_v6, 16  ;;  %vm326_vm2 = vcmp.lt.s32.totalorder %v1435_v6, 17  ;;  %vm340_vm4 = vcmp.lt.s32.totalorder %v1435_v6, 15  ;;  %p1639_p0 = scmp.ne.s32.totalorder %s1634_s9, 0 }
  0x6e   : > { %320 = vrot.lane.b32.xlu0 %v1396_v0, %s1168_s27  ;;  %345 = vrot.lane.b32.xlu1 %v1404_v1, %s1166_s29  ;;  %vm354_vm5 = vcmp.lt.s32.totalorder %v1435_v6, 127  ;;  %vm368_vm6 = vcmp.lt.s32.totalorder %v1435_v6, 112  ;;  %vm361_vm7 = vcmp.lt.s32.totalorder %v1435_v6, 113  ;;  %vm375_vm8 = vcmp.lt.s32.totalorder %v1435_v6, 111 }
  0x6f   : > { %vm616_vm11 = vcmask 1045504   ;;  %vm631_vm12 = vcmask 146432  }
  0x72   : > { %322 = vrot.lane.b32.xlu1 %v1404_v1, %s1168_s27  ;;  %331 = vrot.lane.b32.xlu0 %v1404_v1, %s1167_s14 }
  0x76   : > { %338 = vrot.lane.b32.xlu1 %v1404_v1, %s1169_s16  ;;  %336 = vrot.lane.b32.xlu0 %v1396_v0, %s1169_s16 }
  0x7a   : > { %352 = vrot.lane.b32.xlu1 %v1404_v1, %s1170_s7  ;;  %350 = vrot.lane.b32.xlu0 %v1396_v0, %s1170_s7 }
  0x7e   : > { %366 = vrot.lane.b32.xlu1 %v1404_v1, %s1171_s17  ;;  %364 = vrot.lane.b32.xlu0 %v1396_v0, %s1171_s17 }
  0x82   : > { %359 = vrot.lane.b32.xlu1 %v1404_v1, %s1173_s19  ;;  %357 = vrot.lane.b32.xlu0 %v1396_v0, %s1173_s19 }
  0x86   : > { %373 = vrot.lane.b32.xlu1 %v1404_v1, %s1174_s12  ;;  %371 = vrot.lane.b32.xlu0 %v1396_v0, %s1174_s12 }
  0xdc   : > { %v344_v4 = vpop.permute.xlu1 %343  ;;  %v330_v5 = vpop.permute.xlu0 %329 }
  0xe0   : > { %v321_v7 = vpop.permute.xlu0 %320  ;;  %v346_v8 = vpop.permute.xlu1 %345 }
  0xe1   : > { %v348_v11 = vsel %vm347_vm0, %v344_v4, %v346_v8  ;;  %v349_v12 = vsel %vm347_vm0, %v346_v8, %v344_v4  ;;  %v308_v8 = vld [vmem:[#allocation5 + $0x40] sm:$0xf] }
  0xe2   : > { %v386_v20 = vrot.slane %v349_v12, 4  ;;  %v387_v21 = vrot.slane %v348_v11, 4 }
  0xe4   : > { %v323_v9 = vpop.permute.xlu1 %322  ;;  %v332_v10 = vpop.permute.xlu0 %331 }
  0xe5   : > { %v334_v13 = vsel %vm333_vm1, %v330_v5, %v332_v10  ;;  %v335_v14 = vsel %vm333_vm1, %v332_v10, %v330_v5  ;;  %v327_v17 = vsel %vm326_vm2, %v321_v7, %v323_v9  ;;  %v328_v18 = vsel %vm326_vm2, %v323_v9, %v321_v7 }
  0xe6   : > { %v380_v15 = vrot.slane %v335_v14, 4  ;;  %v381_v16 = vrot.slane %v334_v13, 4 }
  0xe8   : > { %v339_v22 = vpop.permute.xlu1 %338  ;;  %v337_v23 = vpop.permute.xlu0 %336  ;;  %v404_v25 = vsel %vm402_vm3, %v327_v17, %v381_v16  ;;  %v403_v28 = vsel %vm402_vm3, %v328_v18, %v380_v15  ;;  %v297_v15 = vld [vmem:[%s1620_s1] sm:$0x3] }
  0xe9   : > { %v341_v29 = vsel %vm340_vm4, %v337_v23, %v339_v22  ;;  %v342_v30 = vsel %vm340_vm4, %v339_v22, %v337_v23  ;;  %v412_v33 = vmul.f32 %v404_v25, %v301_v19  ;;  %v411_v35 = vmul.f32 %v403_v28, %v300_v26 }
  0xea   : > { %v405_v31 = vsel %vm402_vm3, %v342_v30, %v386_v20  ;;  %v406_v32 = vsel %vm402_vm3, %v341_v29, %v387_v21 }
  0xeb   : > { %v414_v34 = vmul.f32 %v406_v32, %v303_v24  ;;  %v413_v36 = vmul.f32 %v405_v31, %v302_v27 }
  0xec   : > { %v353_v37 = vpop.permute.xlu1 %352  ;;  %v351_v38 = vpop.permute.xlu0 %350 }
  0xed   : > { %v355_v39 = vsel %vm354_vm5, %v351_v38, %v353_v37  ;;  %v356_v40 = vsel %vm354_vm5, %v353_v37, %v351_v38  ;;  %v903_v41 = vpack.c.bf16 %v414_v34, %v412_v33  ;;  %v905_v42 = vpack.c.bf16 %v413_v36, %v411_v35 }
  0xee   : > { %v392_v43 = vrot.slane %v355_v39, 4  ;;  %v393_v44 = vrot.slane %v356_v40, 4 }
  0xef   : > { %904 = vmatprep.subr.bf16.mxu0 %v903_v41 }
  0xf0   : > { %v367_v45 = vpop.permute.xlu1 %366  ;;  %v365_v46 = vpop.permute.xlu0 %364  ;;  %906 = vmatpush1.bf16.msra.mxu0 %v905_v42  ;;  %v407_v50 = vsel %vm402_vm3, %v1396_v0, %v392_v43  ;;  %v408_v51 = vsel %vm402_vm3, %v1404_v1, %v393_v44  ;;  %v309_v1 = vld [vmem:[#allocation5 + $0x48] sm:$0xf] }
  0xf1   : > { %v369_v47 = vsel %vm368_vm6, %v365_v46, %v367_v45  ;;  %v370_v48 = vsel %vm368_vm6, %v367_v45, %v365_v46  ;;  %v416_v2 = vmul.f32 %v408_v51, %v305_v49  ;;  %v415_v4 = vmul.f32 %v407_v50, %v304_v58 }
  0xf2   : > { %v398_v52 = vrot.slane %v369_v47, 4  ;;  %v399_v53 = vrot.slane %v370_v48, 4 }
  0xf4   : > { %v360_v54 = vpop.permute.xlu1 %359  ;;  %v358_v55 = vpop.permute.xlu0 %357 }
  0xf5   : > { %v362_v59 = vsel %vm361_vm7, %v358_v55, %v360_v54  ;;  %v363_v60 = vsel %vm361_vm7, %v360_v54, %v358_v55 }
  0xf6   : > { %v409_v61 = vsel %vm402_vm3, %v362_v59, %v398_v52  ;;  %v410_v62 = vsel %vm402_vm3, %v363_v60, %v399_v53 }
  0xf7   : > { %v417_v63 = vmul.f32 %v409_v61, %v306_v56  ;;  %v418_v0 = vmul.f32 %v410_v62, %v307_v57 }
  0xf8   : > { %v374_v5 = vpop.permute.xlu1 %373  ;;  %v372_v7 = vpop.permute.xlu0 %371 }
  0xf9   : > { %v376_v9 = vsel %vm375_vm8, %v372_v7, %v374_v5  ;;  %v377_v10 = vsel %vm375_vm8, %v374_v5, %v372_v7  ;;  %v907_v11 = vpack.c.bf16 %v418_v0, %v416_v2  ;;  %v909_v12 = vpack.c.bf16 %v417_v63, %v415_v4 }
  0xfa   : > { %v420_v13 = vmul.f32 %v377_v10, %v309_v1  ;;  %v419_v14 = vmul.f32 %v376_v9, %v308_v8 }
  0xfb   : > { %908 = vmatprep.subr.bf16.mxu0 %v907_v11 }
  0xfc   : > { %910 = vmatpush1.bf16.msra.mxu0 %v909_v12 }
  0xfd   : > { %890 = vmatprep.subr.msk.mxu0 %vm402_vm3, %v420_v13 }
 0x100   : > { %891 = vmatpush1.msk.msra.mxu0 %vm402_vm3, %v419_v14 }
 0x101   : > { %892 = vmatmul.mubr.msk.f32.vlgmr.msra.gmra.mrb[0].mxu0 %vm421_vm9, %v297_v15 }
 0x1d4   : > { %v497_v16 = vpop.f32.mrb[0].mxu0 }
 0x1d5   : > { %v508_v17 = vmul.f32 %v497_v16, %v497_v16  ;;  %v499_v18 = vpop.f32.mrb[1].mxu0  ;;  %v503_v19 = vsel %vm502_vm10, %v497_v16, 0.0 }
 0x1d6   : > { %v504_v20 = vsel %vm502_vm10, %v499_v18, 0.0  ;;  %v509_v21 = vmul.f32 %v499_v18, %v499_v18 }
 0x1d7   : > { %v505_v22 = vadd.f32 %v504_v20, %v503_v19  ;;  %v510_v23 = vsel %vm502_vm10, %v508_v17, 0.0 }
 0x1d8   : > { %v511_v24 = vsel %vm502_vm10, %v509_v21, 0.0 }
 0x1d9   : > { %506 = vadd.xlane.f32.xlu0 %v505_v22  ;;  %v512_v25 = vadd.f32 %v511_v24, %v510_v23  ;;  %v311_v22 = vld [vmem:[#allocation7 + $0x8] sm:$0xff] }
 0x1db   : > { %513 = vadd.xlane.f32.xlu1 %v512_v25 }
 0x266   : > { %v507_v26 = vpop.xlane.xlu0 %506 }
 0x267   : > { %v515_v27 = vmul.f32 0.00390625, %v507_v26  ;;  %v313_v26 = vld [vmem:[#allocation7 + $0x18] sm:$0xff] }
 0x268   : > { %v514_v28 = vpop.xlane.xlu1 %513 }
 0x269   : > { %v516_v29 = vmul.f32 0.00390625, %v514_v28  ;;  %v517_v30 = vmul.f32 %v515_v27, %v515_v27  ;;  %v520_v34 = vsub.f32 %v497_v16, %v515_v27  ;;  %v521_v35 = vsub.f32 %v499_v18, %v515_v27  ;;  %v310_v28 = vld [vmem:[#allocation7] sm:$0xff] }
 0x26b   : > { %v518_v31 = vsub.f32 %v516_v29, %v517_v30  ;;  %v312_v29 = vld [vmem:[#allocation7 + $0x10] sm:$0xff] }
 0x26d   : > { %v519_v32 = vmax.f32 %v518_v31, 0.0 }
 0x26f   : > { %v522_v33 = vadd.f32 1e-05, %v519_v32 }
 0x271   : > { %999 = vrsqrt.f32 %v522_v33 }
 0x27b   : > { %v1000_v36 = vpop.eup %999 }
 0x27c   : > { %v524_v37 = vmul.f32 %v1000_v36, %v520_v34  ;;  %v525_v38 = vmul.f32 %v1000_v36, %v521_v35 }
 0x27e   : > { %v526_v39 = vmax.f32 %v524_v37, 0.0  ;;  %v527_v40 = vmax.f32 %v525_v38, 0.0 }
 0x280   : > { %536 = vrot.lane.b32.xlu1 %v527_v40, %s1167_s14  ;;  %534 = vrot.lane.b32.xlu0 %v526_v39, %s1167_s14  ;;  %s902_s14 = sshll.u32 %s1234_s25, 7  ;;  %s1177_s25 = smov [#allocation8]  }
 0x284   : > { %554 = vrot.lane.b32.xlu1 %v527_v40, %s1170_s7  ;;  %552 = vrot.lane.b32.xlu0 %v526_v39, %s1170_s7 }
 0x288   : > { %542 = vrot.lane.b32.xlu1 %v527_v40, %s1169_s16  ;;  %540 = vrot.lane.b32.xlu0 %v526_v39, %s1169_s16 }
 0x28c   : > { %560 = vrot.lane.b32.xlu1 %v527_v40, %s1173_s19  ;;  %558 = vrot.lane.b32.xlu0 %v526_v39, %s1173_s19  ;;  %s1575_s19 = scalar_lea.hbm %s1625_s6, %s902_s14 }
 0x290   : > { %530 = vrot.lane.b32.xlu1 %v527_v40, %s1168_s27  ;;  %528 = vrot.lane.b32.xlu0 %v526_v39, %s1168_s27  ;;  %s296_s27 = scalar_lea.vmem [#allocation8], %s886_s30  ;;  %s1093_s30 = sshll.u32 %s1177_s25, 4  ;;  %s1094_s30 = int_to_ptr.vmem [resolvable:$false] %s1093_s30 }
 0x291   : > { %s788_s16 = sshll.u32 %s296_s27, 4  ;;  %s1095_s15 = scalar_lea.vmem %s1094_s30, 256  ;;  %s1577_s16 = int_to_ptr.vmem [resolvable:$true] %s788_s16 }
 0x292   : > { %s1089_s20 = scalar_lea.vmem %s1577_s16, 128  ;;  %p1096_p7 = scmp.lt.s32.totalorder %s1577_s16, %s1094_s30 }
 0x293   : > { %p1090_p11 = scmp.ne.s32.totalorder %s1577_s16, %s1089_s20  ;;  %p1097_p9 = scmp.lt.s32.totalorder %s1095_s15, %s1089_s20 }
 0x294   : > { %548 = vrot.lane.b32.xlu1 %v527_v40, %s1166_s29  ;;  %546 = vrot.lane.b32.xlu0 %v526_v39, %s1166_s29 }
 0x295   : > { %p1091_p1 = pnand %p1090_p11, %p1639_p0  ;;  %p1098_p12 = por %p1097_p9, %p1096_p7 }
 0x297   : > { %p1092_p3 = pneg %p1091_p1 }
 0x298   : > { %566 = vrot.lane.b32.xlu1 %v527_v40, %s1171_s17  ;;  %564 = vrot.lane.b32.xlu0 %v526_v39, %s1171_s17 }
 0x299   : > { %p1099_p2 = pnand %p1098_p12, %p1092_p3 }
 0x29c   : > { %572 = vrot.lane.b32.xlu1 %v527_v40, %s1174_s12  ;;  %570 = vrot.lane.b32.xlu0 %v526_v39, %s1174_s12  ;;  %s774_s12 = scalar_lea.sflag [#allocation4], %s1382_s18 }
 0x2f2   : > { %v537_v41 = vpop.permute.xlu1 %536  ;;  %v535_v42 = vpop.permute.xlu0 %534 }
 0x2f3   : > { %v538_v49 = vsel %vm333_vm1, %v535_v42, %v537_v41  ;;  %v539_v50 = vsel %vm333_vm1, %v537_v41, %v535_v42  ;;  %v315_v41 = vld [vmem:[#allocation7 + $0x28] sm:$0x3] }
 0x2f4   : > { %v578_v55 = vrot.slane %v539_v50, 6  ;;  %v579_v56 = vrot.slane %v538_v49, 6  ;;  %v298_v49 = vld [vmem:[%s1621_s2] sm:$0x3]  ;;  %v1175_v50 = vmov 1  }
 0x2f5   : > { %996 = vset.pattern.permute.xlu1 %v1175_v50 }
 0x2f6   : > { %v555_v43 = vpop.permute.xlu1 %554  ;;  %v553_v44 = vpop.permute.xlu0 %552 }
 0x2f7   : > { %v556_v51 = vsel %vm354_vm5, %v553_v44, %v555_v43  ;;  %v557_v52 = vsel %vm354_vm5, %v555_v43, %v553_v44 }
 0x2f8   : > { %v596_v57 = vrot.slane %v556_v51, 6  ;;  %v597_v58 = vrot.slane %v557_v52, 6  ;;  %v1176_v51 = vmov 0  }
 0x2f9   : > { %995 = vset.pattern.permute.xlu0 %v1176_v51 }
 0x2fa   : > { %v543_v45 = vpop.permute.xlu1 %542  ;;  %v541_v46 = vpop.permute.xlu0 %540  ;;  %v619_v15 = vsel %vm502_vm10, %v526_v39, %v596_v57  ;;  %v620_v16 = vsel %vm502_vm10, %v527_v40, %v597_v58 }
 0x2fb   : > { %v544_v61 = vsel %vm340_vm4, %v541_v46, %v543_v45  ;;  %v545_v62 = vsel %vm340_vm4, %v543_v45, %v541_v46  ;;  %v314_v45 = vld [vmem:[#allocation7 + $0x20] sm:$0x3] }
 0x2fc   : > { %v584_v11 = vrot.slane %v545_v62, 4  ;;  %v585_v12 = vrot.slane %v544_v61, 4  ;;  %v299_v61 = vld [vmem:[%s1622_s3] sm:$0xf] }
 0x2fe   : > { %v561_v47 = vpop.permute.xlu1 %560  ;;  %v559_v48 = vpop.permute.xlu0 %558 }
 0x2ff   : > { %v562_v63 = vsel %vm361_vm7, %v559_v48, %v561_v47  ;;  %v563_v0 = vsel %vm361_vm7, %v561_v47, %v559_v48 }
 0x300   : > { %v602_v13 = vrot.slane %v562_v63, 4  ;;  %v603_v14 = vrot.slane %v563_v0, 4 }
 0x302   : > { %v531_v53 = vpop.permute.xlu1 %530  ;;  %v529_v54 = vpop.permute.xlu0 %528  ;;  %v621_v31 = vsel %vm402_vm3, %v619_v15, %v602_v13  ;;  %v622_v32 = vsel %vm402_vm3, %v620_v16, %v603_v14 }
 0x303   : > { %v532_v59 = vsel %vm326_vm2, %v529_v54, %v531_v53  ;;  %v533_v60 = vsel %vm326_vm2, %v531_v53, %v529_v54 }
 0x304   : > { %v612_v7 = vsel %vm502_vm10, %v533_v60, %v578_v55  ;;  %v613_v8 = vsel %vm502_vm10, %v532_v59, %v579_v56 }
 0x305   : > { %v614_v19 = vsel %vm402_vm3, %v612_v7, %v584_v11  ;;  %v615_v23 = vsel %vm402_vm3, %v613_v8, %v585_v12  ;;  %v743_v8 = vshrl.u32 %v324_v3, 7 }
 0x306   : > { %v549_v1 = vpop.permute.xlu1 %548  ;;  %v547_v2 = vpop.permute.xlu0 %546 }
 0x307   : > { %v550_v4 = vsel %vm347_vm0, %v547_v2, %v549_v1  ;;  %v551_v5 = vsel %vm347_vm0, %v549_v1, %v547_v2  ;;  %v758_v12 = vsub.s32 1, %v743_v8  ;;  %v744_v15 = vsub.s32 0, %v743_v8 }
 0x308   : > { %v590_v9 = vrot.slane %v551_v5, 2  ;;  %v591_v10 = vrot.slane %v550_v4, 2 }
 0x30a   : > { %v567_v17 = vpop.permute.xlu1 %566  ;;  %v565_v18 = vpop.permute.xlu0 %564  ;;  %v618_v27 = vsel %vm616_vm11, %v615_v23, %v591_v10  ;;  %v617_v30 = vsel %vm616_vm11, %v614_v19, %v590_v9 }
 0x30b   : > { %v568_v20 = vsel %vm368_vm6, %v565_v18, %v567_v17  ;;  %v569_v21 = vsel %vm368_vm6, %v567_v17, %v565_v18  ;;  %v626_v37 = vmul.f32 %v618_v27, %v311_v22  ;;  %v625_v39 = vmul.f32 %v617_v30, %v310_v28 }
 0x30c   : > { %v608_v24 = vrot.slane %v568_v20, 2  ;;  %v609_v25 = vrot.slane %v569_v21, 2 }
 0x30e   : > { %v573_v33 = vpop.permute.xlu1 %572  ;;  %v571_v34 = vpop.permute.xlu0 %570  ;;  %v624_v35 = vsel %vm616_vm11, %v622_v32, %v609_v25  ;;  %v623_v36 = vsel %vm616_vm11, %v621_v31, %v608_v24 }
 0x30f   : > { %v628_v38 = vmul.f32 %v624_v35, %v313_v26  ;;  %v627_v40 = vmul.f32 %v623_v36, %v312_v29  ;;  %v575_v42 = vsel %vm375_vm8, %v573_v33, %v571_v34  ;;  %v574_v46 = vsel %vm375_vm8, %v571_v34, %v573_v33 }
 0x310   : > { %v630_v47 = vmul.f32 %v575_v42, %v315_v41  ;;  %v629_v48 = vmul.f32 %v574_v46, %v314_v45 }
 0x311   : > { %v911_v43 = vpack.c.bf16 %v628_v38, %v626_v37  ;;  %v913_v44 = vpack.c.bf16 %v627_v40, %v625_v39 }
 0x313   : > { %912 = vmatprep.subr.bf16.mxu1 %v911_v43 }
 0x314   : > { %914 = vmatpush1.bf16.msra.mxu1 %v913_v44 }
 0x315   : > { %893 = vmatprep.subr.msk.mxu1 %vm502_vm10, %v630_v47 }
 0x318   : > { %894 = vmatpush1.msk.msra.mxu1 %vm502_vm10, %v629_v48 }
 0x319   : > { %895 = vmatmul.mubr.msk.f32.vlgmr.msra.gmra.mrb[0].mxu1 %vm631_vm12, %v298_v49 }
 0x3ec   : > { %v707_v6 = vpop.f32.mrb[0].mxu1 }
 0x3ed   : > { %v717_v52 = vmul.f32 %v707_v6, %v707_v6  ;;  %v709_v53 = vpop.f32.mrb[1].mxu1  ;;  %v712_v54 = vsel %vm502_vm10, %v707_v6, 0.0 }
 0x3ee   : > { %v713_v55 = vsel %vm502_vm10, %v709_v53, 0.0  ;;  %v718_v56 = vmul.f32 %v709_v53, %v709_v53 }
 0x3ef   : > { %v714_v57 = vadd.f32 %v713_v55, %v712_v54  ;;  %v719_v58 = vsel %vm502_vm10, %v717_v52, 0.0 }
 0x3f0   : > { %v720_v59 = vsel %vm502_vm10, %v718_v56, 0.0 }
 0x3f1   : > { %715 = vadd.xlane.f32.xlu0 %v714_v57  ;;  %v721_v60 = vadd.f32 %v720_v59, %v719_v58 }
 0x3f3   : > { %722 = vadd.xlane.f32.xlu1 %v721_v60 }
 0x404   : > { %753 = vperm.xlu1 %996, %v299_v61  }
 0x407   : > { %739 = vperm.xlu0 %995, %v299_v61  }
 0x40b   : > { %997 = vset.pattern.permute.xlu0 %v1175_v50 }
 0x47e   : > { %v716_v62 = vpop.xlane.xlu0 %715 }
 0x47f   : > { %v724_v63 = vmul.f32 0.00390625, %v716_v62 }
 0x480   : > { %v723_v0 = vpop.xlane.xlu1 %722 }
 0x481   : > { %v725_v1 = vmul.f32 0.00390625, %v723_v0  ;;  %v726_v2 = vmul.f32 %v724_v63, %v724_v63  ;;  %v729_v9 = vsub.f32 %v707_v6, %v724_v63  ;;  %v730_v10 = vsub.f32 %v709_v53, %v724_v63 }
 0x483   : > { %v727_v4 = vsub.f32 %v725_v1, %v726_v2 }
 0x484   : > { %v754_v18 = vpop.permute.xlu1 %753 }
 0x485   : > { %v728_v5 = vmax.f32 %v727_v4, 0.0 }
 0x486   : > { %v740_v19 = vpop.permute.xlu0 %739 }
 0x487   : > { %v731_v7 = vadd.f32 1e-05, %v728_v5 }
 0x489   : > { %1001 = vrsqrt.f32 %v731_v7 }
 0x493   : > { %v1002_v11 = vpop.eup %1001 }
 0x494   : > { %v733_v13 = vmul.f32 %v1002_v11, %v729_v9  ;;  %v734_v14 = vmul.f32 %v1002_v11, %v730_v10 }
 0x496   : > { %v735_v16 = vmax.f32 %v733_v13, 0.0  ;;  %v736_v17 = vmax.f32 %v734_v14, 0.0 }
 0x498   : > { %v759_v20 = vrot.slane %v735_v16, %v758_v12  ;;  %v763_v21 = vrot.slane %v736_v17, %v758_v12  ;;  %v745_v22 = vrot.slane %v735_v16, %v744_v15  ;;  %v749_v23 = vrot.slane %v736_v17, %v744_v15 }
 0x49a   : > { %v764_v24 = vmul.f32 %v759_v20, %v754_v18  ;;  %v765_v3 = vmul.f32 %v763_v21, %v754_v18  ;;  %v750_v25 = vmul.f32 %v745_v22, %v740_v19  ;;  %v751_v26 = vmul.f32 %v749_v23, %v740_v19 }
 0x49c   : > { %v766_v27 = vadd.f32 %v764_v24, %v750_v25  ;;  %v767_v28 = vadd.f32 %v765_v3, %v751_v26 }
 0x49e   : > { %v770_v29 = vcombine.low %v766_v27, %v767_v28 }
 0x4a0   : > { %772 = vst [vmem:[%s296_s27] sm:$0xff] %v770_v29 }
 0x4a1   : > { %1102 = shalt.err (!%p1099_p2)
}
 0x4a2   : > { %s1103_s18 = scalar_lea.hbm %s1575_s19, 128  ;;  %s1107_s10 = scalar_lea.hbm %s1625_s6, 256 }
 0x4a3   : > { %p1104_p13 = scmp.ne.s32.totalorder %s1575_s19, %s1103_s18  ;;  %p1108_p4 = scmp.lt.u32.totalorder %s1575_s19, %s1625_s6 }
 0x4a4   : > { %p1109_p5 = scmp.lt.u32.totalorder %s1107_s10, %s1103_s18  ;;  %p1111_p11 = scmp.lt.u32.totalorder %s1103_s18, %s1575_s19 }
 0x4a5   : > { %p1105_p6 = pnand %p1104_p13, %p1639_p0 }
 0x4a6   : > { %p1110_p8 = por %p1109_p5, %p1108_p4 }
 0x4a7   : > { %p1106_p10 = pneg %p1105_p6 }
 0x4a8   : > { %p1112_p1 = por %p1111_p11, %p1110_p8 }
 0x4aa   : > { %p1113_p3 = pnand %p1112_p1, %p1106_p10 }
 0x4ac   : > { %1116 = shalt.err (!%p1113_p3)
}
 0x4ad   : > { %925 = dma.vmem_to_hbm [thread:$0]  (%p1639_p0), %s1577_s16, 128, %s1575_s19, %s774_s12  }
 0x4ae PF: > { %s800_s27 = sand.u32 1, %s1147_s21   ;;  %p1640_p7 = scmp.ne.s32.totalorder %s1630_s28, 0 }
 0x4af   : > { %p1641_p9 = scmp.ge.s32.totalorder %s1159_s24, 2  ;;  %s801_s7 = scalar_lea.sflag [#allocation4], %s800_s27 }
 0x4b1   : > { %p939_p12 = pnand %p1641_p9, %p1640_p7 }
 0x4b3   : > { %1142 = dma.done.wait (!%p939_p12), %s801_s7, 128  }
 0x4b4   : > { %1144 = vsyncadd (!%p939_p12), %s801_s7, 4294967168  ;;  %p20_p2 = scmp.ge.s32.totalorder %s1323_s26, 4   ;;  %s1642_s21 = smov %s1151_s22 }
 0x4b5   : > { %s1643_s22 = smov %s1155_s23  ;;  %s1644_s23 = smov %s1339_s11 }
 0x4b6   : > { %s1645_s24 = smov %s1323_s26  ;;  %22 = sbr.rel (!%p20_p2) target bundleno = 6 (0x6), region = 97 }
 0x4bd   :  { %806 = vsyncpa [#allocation3], 1 }
 0x4be   :  { %808 = vsyncpa [#allocation3 + $0x1], 1 }
 0x4bf   :  { %809 = vsyncpa [#allocation6], 1 }
 0x4c0   :  { %810 = vsyncpa [#allocation4], 1 }
 0x4c1   :  { %812 = vsyncpa [#allocation4 + $0x1], 1 }

</bundles_post_ra>
